<compile_context>
chip_gen: v7x
topology: tpu7x:2x2x1
jax: 0.10.0
libtpu: 0.0.40
codegen_flags: <defaults>
</compile_context>

<pallas_src>
import jax
import jax.numpy as jnp
from jax.experimental import pallas as pl
from jax.experimental.pallas import tpu as pltpu


def _lstm_seq_kernel(x_ref, wih_ref, whh_ref, b_ref, h0_ref, c0_ref, hc_out_ref):
    """Runs the whole LSTMCell recurrence inside one Pallas program.

    x_ref:      (seq, emb)     VMEM
    wih_ref:    (emb, 4*H)     VMEM  (W_ih^T, gate cols [i,f,o,g], g-cols x2)
    whh_ref:    (H,   4*H)     VMEM  (W_hh^T, gate cols [i,f,o,g], g-cols x2)
    b_ref:      (1,   4*H)     VMEM  (b_ih + b_hh, gate cols [i,f,o,g], g-cols x2)
    h0_ref:     (1,   H)       VMEM
    c0_ref:     (1,   H)       VMEM
    hc_out_ref: (2,   H)       VMEM  (row 0 = final h, row 1 = final c)
    """
    seq = x_ref.shape[0]
    H = h0_ref.shape[1]

    whh = whh_ref[...]  # loaded once, reused every step

    # Hoisted input projection: one (seq, emb) x (emb, 4H) matmul + bias add.
    # No sequential dependency -> off the critical path of the recurrence.
    x_proj = (jnp.dot(x_ref[...], wih_ref[...],
                      preferred_element_type=jnp.float32)
              + b_ref[...])                                       # (seq, 4H)

    h = h0_ref[...]                                               # (1, H)
    c = c0_ref[...]                                               # (1, H)

    # Fully unrolled recurrence (seq is static and small).
    for t in range(seq):
        gates = x_proj[t:t + 1, :] + jnp.dot(
            h, whh, preferred_element_type=jnp.float32)           # (1, 4H)
        # One full-width sigmoid covers all four gates (g pre-activation was
        # pre-scaled by 2 so tanh(g) == 2*sigmoid(2g) - 1).
        sig = jax.nn.sigmoid(gates)
        i = sig[:, 0:H]
        f = sig[:, H:2 * H]
        o = sig[:, 2 * H:3 * H]
        g = 2.0 * sig[:, 3 * H:4 * H] - 1.0                       # == tanh(g_pre)
        c = f * c + i * g
        h = o * jnp.tanh(c)

    hc_out_ref[0:1, :] = h
    hc_out_ref[1:2, :] = c


def _reorder_and_scale_gates(w, H):
    """Permute last axis from PyTorch gate order [i, f, g, o] to [i, f, o, g]
    and pre-scale the g-columns by 2 (tanh-via-sigmoid trick)."""
    return jnp.concatenate(
        [w[..., 0:2 * H],            # i, f
         w[..., 3 * H:4 * H],        # o
         2.0 * w[..., 2 * H:3 * H]], # g (x2)
        axis=-1)


def rnn_encoder_forward(stacked_info, params):
    """stacked_info: (seq, emb_size) float32.  Returns (h, c), each (outdim,)."""
    w_ih, w_hh, b_ih, b_hh, init_hid, init_cell = (
        params["w_ih"], params["w_hh"], params["b_ih"], params["b_hh"],
        params["init_hid"], params["init_cell"])
    outdim = init_hid.shape[-1]

    wih_t = _reorder_and_scale_gates(jnp.transpose(w_ih), outdim)   # (emb, 4H)
    whh_t = _reorder_and_scale_gates(jnp.transpose(w_hh), outdim)   # (H,   4H)
    bias = _reorder_and_scale_gates(
        (b_ih + b_hh).reshape(1, 4 * outdim), outdim)               # (1,   4H)

    vmem_spec = pl.BlockSpec(memory_space=pltpu.MemorySpace.VMEM)

    hc = pl.pallas_call(
        _lstm_seq_kernel,
        out_shape=jax.ShapeDtypeStruct((2, outdim), jnp.float32),
        in_specs=[vmem_spec] * 6,
        out_specs=vmem_spec,
    )(stacked_info, wih_t, whh_t, bias, init_hid, init_cell)

    # TODO(synk): if batched sequences are ever added, introduce a leading
    # "parallel" grid axis (megacore) and a seq-blocked BlockSpec over x.
    return hc[0], hc[1]


def _reference_forward(stacked_info, params):
    """Pure-JAX reference matching PyTorch LSTMCell semantics (gate order i,f,g,o)."""
    w_ih, w_hh, b_ih, b_hh = (params["w_ih"], params["w_hh"],
                              params["b_ih"], params["b_hh"])
    h = params["init_hid"]
    c = params["init_cell"]
    H = h.shape[-1]
    for t in range(stacked_info.shape[0]):
        x_t = stacked_info[t][None, :]
        gates = x_t @ w_ih.T + b_ih + h @ w_hh.T + b_hh
        i = jax.nn.sigmoid(gates[:, 0:H])
        f = jax.nn.sigmoid(gates[:, H:2 * H])
        g = jnp.tanh(gates[:, 2 * H:3 * H])
        o = jax.nn.sigmoid(gates[:, 3 * H:4 * H])
        c = f * c + i * g
        h = o * jnp.tanh(c)
    return h[0], c[0]


if __name__ == "__main__":
    emb_size = 32
    outdim = 32
    seq = 8

    key = jax.random.PRNGKey(0)
    k0, k1, k2, k3, k4, k5, k6 = jax.random.split(key, 7)

    params = {
        # nn.LSTMCell(emb_size, outdim) parameter shapes:
        "w_ih": jax.random.normal(k0, (4 * outdim, emb_size), jnp.float32) * 0.1,
        "w_hh": jax.random.normal(k1, (4 * outdim, outdim), jnp.float32) * 0.1,
        "b_ih": jax.random.normal(k2, (4 * outdim,), jnp.float32) * 0.1,
        "b_hh": jax.random.normal(k3, (4 * outdim,), jnp.float32) * 0.1,
        # nn.Parameter(torch.randn(outdim).unsqueeze(0)) -> (1, outdim)
        "init_hid": jax.random.normal(k4, (1, outdim), jnp.float32),
        "init_cell": jax.random.normal(k5, (1, outdim), jnp.float32),
    }

    stacked_info = jax.random.normal(k6, (seq, emb_size), jnp.float32)

    h, c = rnn_encoder_forward(stacked_info, params)
    jax.block_until_ready((h, c))

    h_ref, c_ref = _reference_forward(stacked_info, params)
    assert h.shape == (outdim,) and c.shape == (outdim,)
    assert jnp.allclose(h, h_ref, atol=1e-4, rtol=1e-4), (
        f"h mismatch: max abs err {jnp.max(jnp.abs(h - h_ref))}")
    assert jnp.allclose(c, c_ref, atol=1e-4, rtol=1e-4), (
        f"c mismatch: max abs err {jnp.max(jnp.abs(c - c_ref))}")

    print("KERNEL_OK")
</pallas_src>

<mosaic_0001>
module attributes {stable_mosaic.version = 11 : i64} {
  func.func @_lstm_seq_kernel(%arg0: memref<8x32xf32, #tpu.memory_space<vmem>>, %arg1: memref<32x128xf32, #tpu.memory_space<vmem>>, %arg2: memref<32x128xf32, #tpu.memory_space<vmem>>, %arg3: memref<1x128xf32, #tpu.memory_space<vmem>>, %arg4: memref<1x32xf32, #tpu.memory_space<vmem>>, %arg5: memref<1x32xf32, #tpu.memory_space<vmem>>, %arg6: memref<2x32xf32, #tpu.memory_space<vmem>>) attributes {dimension_semantics = [], scalar_prefetch = 0 : i64, scratch_operands = 0 : i64, tpu.core_type = #tpu.core_type<tc>} {
    %c0 = arith.constant 0 : index
    %c0_0 = arith.constant 0 : index
    %0 = vector.load %arg2[%c0, %c0_0] : memref<32x128xf32, #tpu.memory_space<vmem>>, vector<32x128xf32>
    %c0_1 = arith.constant 0 : index
    %c0_2 = arith.constant 0 : index
    %1 = vector.load %arg0[%c0_1, %c0_2] : memref<8x32xf32, #tpu.memory_space<vmem>>, vector<8x32xf32>
    %c0_3 = arith.constant 0 : index
    %c0_4 = arith.constant 0 : index
    %2 = vector.load %arg1[%c0_3, %c0_4] : memref<32x128xf32, #tpu.memory_space<vmem>>, vector<32x128xf32>
    %cst = arith.constant dense<0.000000e+00> : vector<8x128xf32>
    %3 = tpu.matmul %1, %2, %cst {dimension_numbers = #tpu.dot_dimension_numbers<[1], [0], [0], [1], [0, 0, 1, 1], [], []>} : vector<8x32xf32>, vector<32x128xf32>, vector<8x128xf32> -> vector<8x128xf32>
    %c0_5 = arith.constant 0 : index
    %c0_6 = arith.constant 0 : index
    %4 = vector.load %arg3[%c0_5, %c0_6] : memref<1x128xf32, #tpu.memory_space<vmem>>, vector<1x128xf32>
    %5 = vector.broadcast %4 : vector<1x128xf32> to vector<8x128xf32>
    %6 = arith.addf %3, %5 : vector<8x128xf32>
    %c0_7 = arith.constant 0 : index
    %c0_8 = arith.constant 0 : index
    %7 = vector.load %arg4[%c0_7, %c0_8] : memref<1x32xf32, #tpu.memory_space<vmem>>, vector<1x32xf32>
    %c0_9 = arith.constant 0 : index
    %c0_10 = arith.constant 0 : index
    %8 = vector.load %arg5[%c0_9, %c0_10] : memref<1x32xf32, #tpu.memory_space<vmem>>, vector<1x32xf32>
    %9 = vector.extract_strided_slice %6 {offsets = [0, 0], sizes = [1, 128], strides = [1, 1]} : vector<8x128xf32> to vector<1x128xf32>
    %cst_11 = arith.constant dense<0.000000e+00> : vector<1x128xf32>
    %10 = tpu.matmul %7, %0, %cst_11 {dimension_numbers = #tpu.dot_dimension_numbers<[1], [0], [0], [1], [0, 0, 1, 1], [], []>} : vector<1x32xf32>, vector<32x128xf32>, vector<1x128xf32> -> vector<1x128xf32>
    %11 = arith.addf %9, %10 : vector<1x128xf32>
    %12 = arith.negf %11 : vector<1x128xf32>
    %13 = math.exp %12 : vector<1x128xf32>
    %cst_12 = arith.constant 1.000000e+00 : f32
    %14 = vector.broadcast %cst_12 : f32 to vector<1x128xf32>
    %15 = arith.addf %14, %13 : vector<1x128xf32>
    %16 = arith.divf %14, %15 : vector<1x128xf32>
    %17 = vector.extract_strided_slice %16 {offsets = [0, 0], sizes = [1, 32], strides = [1, 1]} : vector<1x128xf32> to vector<1x32xf32>
    %18 = vector.extract_strided_slice %16 {offsets = [0, 32], sizes = [1, 32], strides = [1, 1]} : vector<1x128xf32> to vector<1x32xf32>
    %19 = vector.extract_strided_slice %16 {offsets = [0, 64], sizes = [1, 32], strides = [1, 1]} : vector<1x128xf32> to vector<1x32xf32>
    %20 = vector.extract_strided_slice %16 {offsets = [0, 96], sizes = [1, 32], strides = [1, 1]} : vector<1x128xf32> to vector<1x32xf32>
    %cst_13 = arith.constant 2.000000e+00 : f32
    %21 = vector.broadcast %cst_13 : f32 to vector<1x32xf32>
    %22 = arith.mulf %21, %20 : vector<1x32xf32>
    %cst_14 = arith.constant 1.000000e+00 : f32
    %23 = vector.broadcast %cst_14 : f32 to vector<1x32xf32>
    %24 = arith.subf %22, %23 : vector<1x32xf32>
    %25 = arith.mulf %18, %8 : vector<1x32xf32>
    %26 = arith.mulf %17, %24 : vector<1x32xf32>
    %27 = arith.addf %25, %26 : vector<1x32xf32>
    %28 = math.tanh %27 : vector<1x32xf32>
    %29 = arith.mulf %19, %28 : vector<1x32xf32>
    %30 = vector.extract_strided_slice %6 {offsets = [1, 0], sizes = [1, 128], strides = [1, 1]} : vector<8x128xf32> to vector<1x128xf32>
    %cst_15 = arith.constant dense<0.000000e+00> : vector<1x128xf32>
    %31 = tpu.matmul %29, %0, %cst_15 {dimension_numbers = #tpu.dot_dimension_numbers<[1], [0], [0], [1], [0, 0, 1, 1], [], []>} : vector<1x32xf32>, vector<32x128xf32>, vector<1x128xf32> -> vector<1x128xf32>
    %32 = arith.addf %30, %31 : vector<1x128xf32>
    %33 = arith.negf %32 : vector<1x128xf32>
    %34 = math.exp %33 : vector<1x128xf32>
    %cst_16 = arith.constant 1.000000e+00 : f32
    %35 = vector.broadcast %cst_16 : f32 to vector<1x128xf32>
    %36 = arith.addf %35, %34 : vector<1x128xf32>
    %37 = arith.divf %35, %36 : vector<1x128xf32>
    %38 = vector.extract_strided_slice %37 {offsets = [0, 0], sizes = [1, 32], strides = [1, 1]} : vector<1x128xf32> to vector<1x32xf32>
    %39 = vector.extract_strided_slice %37 {offsets = [0, 32], sizes = [1, 32], strides = [1, 1]} : vector<1x128xf32> to vector<1x32xf32>
    %40 = vector.extract_strided_slice %37 {offsets = [0, 64], sizes = [1, 32], strides = [1, 1]} : vector<1x128xf32> to vector<1x32xf32>
    %41 = vector.extract_strided_slice %37 {offsets = [0, 96], sizes = [1, 32], strides = [1, 1]} : vector<1x128xf32> to vector<1x32xf32>
    %cst_17 = arith.constant 2.000000e+00 : f32
    %42 = vector.broadcast %cst_17 : f32 to vector<1x32xf32>
    %43 = arith.mulf %42, %41 : vector<1x32xf32>
    %cst_18 = arith.constant 1.000000e+00 : f32
    %44 = vector.broadcast %cst_18 : f32 to vector<1x32xf32>
    %45 = arith.subf %43, %44 : vector<1x32xf32>
    %46 = arith.mulf %39, %27 : vector<1x32xf32>
    %47 = arith.mulf %38, %45 : vector<1x32xf32>
    %48 = arith.addf %46, %47 : vector<1x32xf32>
    %49 = math.tanh %48 : vector<1x32xf32>
    %50 = arith.mulf %40, %49 : vector<1x32xf32>
    %51 = vector.extract_strided_slice %6 {offsets = [2, 0], sizes = [1, 128], strides = [1, 1]} : vector<8x128xf32> to vector<1x128xf32>
    %cst_19 = arith.constant dense<0.000000e+00> : vector<1x128xf32>
    %52 = tpu.matmul %50, %0, %cst_19 {dimension_numbers = #tpu.dot_dimension_numbers<[1], [0], [0], [1], [0, 0, 1, 1], [], []>} : vector<1x32xf32>, vector<32x128xf32>, vector<1x128xf32> -> vector<1x128xf32>
    %53 = arith.addf %51, %52 : vector<1x128xf32>
    %54 = arith.negf %53 : vector<1x128xf32>
    %55 = math.exp %54 : vector<1x128xf32>
    %cst_20 = arith.constant 1.000000e+00 : f32
    %56 = vector.broadcast %cst_20 : f32 to vector<1x128xf32>
    %57 = arith.addf %56, %55 : vector<1x128xf32>
    %58 = arith.divf %56, %57 : vector<1x128xf32>
    %59 = vector.extract_strided_slice %58 {offsets = [0, 0], sizes = [1, 32], strides = [1, 1]} : vector<1x128xf32> to vector<1x32xf32>
    %60 = vector.extract_strided_slice %58 {offsets = [0, 32], sizes = [1, 32], strides = [1, 1]} : vector<1x128xf32> to vector<1x32xf32>
    %61 = vector.extract_strided_slice %58 {offsets = [0, 64], sizes = [1, 32], strides = [1, 1]} : vector<1x128xf32> to vector<1x32xf32>
    %62 = vector.extract_strided_slice %58 {offsets = [0, 96], sizes = [1, 32], strides = [1, 1]} : vector<1x128xf32> to vector<1x32xf32>
    %cst_21 = arith.constant 2.000000e+00 : f32
    %63 = vector.broadcast %cst_21 : f32 to vector<1x32xf32>
    %64 = arith.mulf %63, %62 : vector<1x32xf32>
    %cst_22 = arith.constant 1.000000e+00 : f32
    %65 = vector.broadcast %cst_22 : f32 to vector<1x32xf32>
    %66 = arith.subf %64, %65 : vector<1x32xf32>
    %67 = arith.mulf %60, %48 : vector<1x32xf32>
    %68 = arith.mulf %59, %66 : vector<1x32xf32>
    %69 = arith.addf %67, %68 : vector<1x32xf32>
    %70 = math.tanh %69 : vector<1x32xf32>
    %71 = arith.mulf %61, %70 : vector<1x32xf32>
    %72 = vector.extract_strided_slice %6 {offsets = [3, 0], sizes = [1, 128], strides = [1, 1]} : vector<8x128xf32> to vector<1x128xf32>
    %cst_23 = arith.constant dense<0.000000e+00> : vector<1x128xf32>
    %73 = tpu.matmul %71, %0, %cst_23 {dimension_numbers = #tpu.dot_dimension_numbers<[1], [0], [0], [1], [0, 0, 1, 1], [], []>} : vector<1x32xf32>, vector<32x128xf32>, vector<1x128xf32> -> vector<1x128xf32>
    %74 = arith.addf %72, %73 : vector<1x128xf32>
    %75 = arith.negf %74 : vector<1x128xf32>
    %76 = math.exp %75 : vector<1x128xf32>
    %cst_24 = arith.constant 1.000000e+00 : f32
    %77 = vector.broadcast %cst_24 : f32 to vector<1x128xf32>
    %78 = arith.addf %77, %76 : vector<1x128xf32>
    %79 = arith.divf %77, %78 : vector<1x128xf32>
    %80 = vector.extract_strided_slice %79 {offsets = [0, 0], sizes = [1, 32], strides = [1, 1]} : vector<1x128xf32> to vector<1x32xf32>
    %81 = vector.extract_strided_slice %79 {offsets = [0, 32], sizes = [1, 32], strides = [1, 1]} : vector<1x128xf32> to vector<1x32xf32>
    %82 = vector.extract_strided_slice %79 {offsets = [0, 64], sizes = [1, 32], strides = [1, 1]} : vector<1x128xf32> to vector<1x32xf32>
    %83 = vector.extract_strided_slice %79 {offsets = [0, 96], sizes = [1, 32], strides = [1, 1]} : vector<1x128xf32> to vector<1x32xf32>
    %cst_25 = arith.constant 2.000000e+00 : f32
    %84 = vector.broadcast %cst_25 : f32 to vector<1x32xf32>
    %85 = arith.mulf %84, %83 : vector<1x32xf32>
    %cst_26 = arith.constant 1.000000e+00 : f32
    %86 = vector.broadcast %cst_26 : f32 to vector<1x32xf32>
    %87 = arith.subf %85, %86 : vector<1x32xf32>
    %88 = arith.mulf %81, %69 : vector<1x32xf32>
    %89 = arith.mulf %80, %87 : vector<1x32xf32>
    %90 = arith.addf %88, %89 : vector<1x32xf32>
    %91 = math.tanh %90 : vector<1x32xf32>
    %92 = arith.mulf %82, %91 : vector<1x32xf32>
    %93 = vector.extract_strided_slice %6 {offsets = [4, 0], sizes = [1, 128], strides = [1, 1]} : vector<8x128xf32> to vector<1x128xf32>
    %cst_27 = arith.constant dense<0.000000e+00> : vector<1x128xf32>
    %94 = tpu.matmul %92, %0, %cst_27 {dimension_numbers = #tpu.dot_dimension_numbers<[1], [0], [0], [1], [0, 0, 1, 1], [], []>} : vector<1x32xf32>, vector<32x128xf32>, vector<1x128xf32> -> vector<1x128xf32>
    %95 = arith.addf %93, %94 : vector<1x128xf32>
    %96 = arith.negf %95 : vector<1x128xf32>
    %97 = math.exp %96 : vector<1x128xf32>
    %cst_28 = arith.constant 1.000000e+00 : f32
    %98 = vector.broadcast %cst_28 : f32 to vector<1x128xf32>
    %99 = arith.addf %98, %97 : vector<1x128xf32>
    %100 = arith.divf %98, %99 : vector<1x128xf32>
    %101 = vector.extract_strided_slice %100 {offsets = [0, 0], sizes = [1, 32], strides = [1, 1]} : vector<1x128xf32> to vector<1x32xf32>
    %102 = vector.extract_strided_slice %100 {offsets = [0, 32], sizes = [1, 32], strides = [1, 1]} : vector<1x128xf32> to vector<1x32xf32>
    %103 = vector.extract_strided_slice %100 {offsets = [0, 64], sizes = [1, 32], strides = [1, 1]} : vector<1x128xf32> to vector<1x32xf32>
    %104 = vector.extract_strided_slice %100 {offsets = [0, 96], sizes = [1, 32], strides = [1, 1]} : vector<1x128xf32> to vector<1x32xf32>
    %cst_29 = arith.constant 2.000000e+00 : f32
    %105 = vector.broadcast %cst_29 : f32 to vector<1x32xf32>
    %106 = arith.mulf %105, %104 : vector<1x32xf32>
    %cst_30 = arith.constant 1.000000e+00 : f32
    %107 = vector.broadcast %cst_30 : f32 to vector<1x32xf32>
    %108 = arith.subf %106, %107 : vector<1x32xf32>
    %109 = arith.mulf %102, %90 : vector<1x32xf32>
    %110 = arith.mulf %101, %108 : vector<1x32xf32>
    %111 = arith.addf %109, %110 : vector<1x32xf32>
    %112 = math.tanh %111 : vector<1x32xf32>
    %113 = arith.mulf %103, %112 : vector<1x32xf32>
    %114 = vector.extract_strided_slice %6 {offsets = [5, 0], sizes = [1, 128], strides = [1, 1]} : vector<8x128xf32> to vector<1x128xf32>
    %cst_31 = arith.constant dense<0.000000e+00> : vector<1x128xf32>
    %115 = tpu.matmul %113, %0, %cst_31 {dimension_numbers = #tpu.dot_dimension_numbers<[1], [0], [0], [1], [0, 0, 1, 1], [], []>} : vector<1x32xf32>, vector<32x128xf32>, vector<1x128xf32> -> vector<1x128xf32>
    %116 = arith.addf %114, %115 : vector<1x128xf32>
    %117 = arith.negf %116 : vector<1x128xf32>
    %118 = math.exp %117 : vector<1x128xf32>
    %cst_32 = arith.constant 1.000000e+00 : f32
    %119 = vector.broadcast %cst_32 : f32 to vector<1x128xf32>
    %120 = arith.addf %119, %118 : vector<1x128xf32>
    %121 = arith.divf %119, %120 : vector<1x128xf32>
    %122 = vector.extract_strided_slice %121 {offsets = [0, 0], sizes = [1, 32], strides = [1, 1]} : vector<1x128xf32> to vector<1x32xf32>
    %123 = vector.extract_strided_slice %121 {offsets = [0, 32], sizes = [1, 32], strides = [1, 1]} : vector<1x128xf32> to vector<1x32xf32>
    %124 = vector.extract_strided_slice %121 {offsets = [0, 64], sizes = [1, 32], strides = [1, 1]} : vector<1x128xf32> to vector<1x32xf32>
    %125 = vector.extract_strided_slice %121 {offsets = [0, 96], sizes = [1, 32], strides = [1, 1]} : vector<1x128xf32> to vector<1x32xf32>
    %cst_33 = arith.constant 2.000000e+00 : f32
    %126 = vector.broadcast %cst_33 : f32 to vector<1x32xf32>
    %127 = arith.mulf %126, %125 : vector<1x32xf32>
    %cst_34 = arith.constant 1.000000e+00 : f32
    %128 = vector.broadcast %cst_34 : f32 to vector<1x32xf32>
    %129 = arith.subf %127, %128 : vector<1x32xf32>
    %130 = arith.mulf %123, %111 : vector<1x32xf32>
    %131 = arith.mulf %122, %129 : vector<1x32xf32>
    %132 = arith.addf %130, %131 : vector<1x32xf32>
    %133 = math.tanh %132 : vector<1x32xf32>
    %134 = arith.mulf %124, %133 : vector<1x32xf32>
    %135 = vector.extract_strided_slice %6 {offsets = [6, 0], sizes = [1, 128], strides = [1, 1]} : vector<8x128xf32> to vector<1x128xf32>
    %cst_35 = arith.constant dense<0.000000e+00> : vector<1x128xf32>
    %136 = tpu.matmul %134, %0, %cst_35 {dimension_numbers = #tpu.dot_dimension_numbers<[1], [0], [0], [1], [0, 0, 1, 1], [], []>} : vector<1x32xf32>, vector<32x128xf32>, vector<1x128xf32> -> vector<1x128xf32>
    %137 = arith.addf %135, %136 : vector<1x128xf32>
    %138 = arith.negf %137 : vector<1x128xf32>
    %139 = math.exp %138 : vector<1x128xf32>
    %cst_36 = arith.constant 1.000000e+00 : f32
    %140 = vector.broadcast %cst_36 : f32 to vector<1x128xf32>
    %141 = arith.addf %140, %139 : vector<1x128xf32>
    %142 = arith.divf %140, %141 : vector<1x128xf32>
    %143 = vector.extract_strided_slice %142 {offsets = [0, 0], sizes = [1, 32], strides = [1, 1]} : vector<1x128xf32> to vector<1x32xf32>
    %144 = vector.extract_strided_slice %142 {offsets = [0, 32], sizes = [1, 32], strides = [1, 1]} : vector<1x128xf32> to vector<1x32xf32>
    %145 = vector.extract_strided_slice %142 {offsets = [0, 64], sizes = [1, 32], strides = [1, 1]} : vector<1x128xf32> to vector<1x32xf32>
    %146 = vector.extract_strided_slice %142 {offsets = [0, 96], sizes = [1, 32], strides = [1, 1]} : vector<1x128xf32> to vector<1x32xf32>
    %cst_37 = arith.constant 2.000000e+00 : f32
    %147 = vector.broadcast %cst_37 : f32 to vector<1x32xf32>
    %148 = arith.mulf %147, %146 : vector<1x32xf32>
    %cst_38 = arith.constant 1.000000e+00 : f32
    %149 = vector.broadcast %cst_38 : f32 to vector<1x32xf32>
    %150 = arith.subf %148, %149 : vector<1x32xf32>
    %151 = arith.mulf %144, %132 : vector<1x32xf32>
    %152 = arith.mulf %143, %150 : vector<1x32xf32>
    %153 = arith.addf %151, %152 : vector<1x32xf32>
    %154 = math.tanh %153 : vector<1x32xf32>
    %155 = arith.mulf %145, %154 : vector<1x32xf32>
    %156 = vector.extract_strided_slice %6 {offsets = [7, 0], sizes = [1, 128], strides = [1, 1]} : vector<8x128xf32> to vector<1x128xf32>
    %cst_39 = arith.constant dense<0.000000e+00> : vector<1x128xf32>
    %157 = tpu.matmul %155, %0, %cst_39 {dimension_numbers = #tpu.dot_dimension_numbers<[1], [0], [0], [1], [0, 0, 1, 1], [], []>} : vector<1x32xf32>, vector<32x128xf32>, vector<1x128xf32> -> vector<1x128xf32>
    %158 = arith.addf %156, %157 : vector<1x128xf32>
    %159 = arith.negf %158 : vector<1x128xf32>
    %160 = math.exp %159 : vector<1x128xf32>
    %cst_40 = arith.constant 1.000000e+00 : f32
    %161 = vector.broadcast %cst_40 : f32 to vector<1x128xf32>
    %162 = arith.addf %161, %160 : vector<1x128xf32>
    %163 = arith.divf %161, %162 : vector<1x128xf32>
    %164 = vector.extract_strided_slice %163 {offsets = [0, 0], sizes = [1, 32], strides = [1, 1]} : vector<1x128xf32> to vector<1x32xf32>
    %165 = vector.extract_strided_slice %163 {offsets = [0, 32], sizes = [1, 32], strides = [1, 1]} : vector<1x128xf32> to vector<1x32xf32>
    %166 = vector.extract_strided_slice %163 {offsets = [0, 64], sizes = [1, 32], strides = [1, 1]} : vector<1x128xf32> to vector<1x32xf32>
    %167 = vector.extract_strided_slice %163 {offsets = [0, 96], sizes = [1, 32], strides = [1, 1]} : vector<1x128xf32> to vector<1x32xf32>
    %cst_41 = arith.constant 2.000000e+00 : f32
    %168 = vector.broadcast %cst_41 : f32 to vector<1x32xf32>
    %169 = arith.mulf %168, %167 : vector<1x32xf32>
    %cst_42 = arith.constant 1.000000e+00 : f32
    %170 = vector.broadcast %cst_42 : f32 to vector<1x32xf32>
    %171 = arith.subf %169, %170 : vector<1x32xf32>
    %172 = arith.mulf %165, %153 : vector<1x32xf32>
    %173 = arith.mulf %164, %171 : vector<1x32xf32>
    %174 = arith.addf %172, %173 : vector<1x32xf32>
    %175 = math.tanh %174 : vector<1x32xf32>
    %176 = arith.mulf %166, %175 : vector<1x32xf32>
    %c0_43 = arith.constant 0 : index
    %c0_44 = arith.constant 0 : index
    %177 = vector.load %arg6[%c0_43, %c0_44] : memref<2x32xf32, #tpu.memory_space<vmem>>, vector<1x32xf32>
    tpu.vector_store %arg6[%c0_43, %c0_44], %176 {strides = array<i32>} : memref<2x32xf32, #tpu.memory_space<vmem>>, vector<1x32xf32>,
    %c1 = arith.constant 1 : index
    %c0_45 = arith.constant 0 : index
    %178 = vector.load %arg6[%c1, %c0_45] : memref<2x32xf32, #tpu.memory_space<vmem>>, vector<1x32xf32>
    tpu.vector_store %arg6[%c1, %c0_45], %174 {strides = array<i32>} : memref<2x32xf32, #tpu.memory_space<vmem>>, vector<1x32xf32>,
    return
  }
}

</mosaic_0001>

<bundles_post_ra>
// kernel: tpu_custom_call.1
= control target key start
LH: loop header
LB: loop body
LE: loop exit
PB: predicated region body
PF: predicated region fallthrough
CT: control target
= control target key end

     0   :  { %11 = vsyncpa [#allocation3], 0  ;;  %s1641_s0 = inlined_call_operand.hbm [shape: f32[8,32], index: 0, kind: input, shape index: {}]   ;;  %s1642_s1 = inlined_call_operand.hbm [shape: f32[32,128], index: 1, kind: input, shape index: {}]   ;;  %s1643_s2 = inlined_call_operand.hbm [shape: f32[32,128], index: 2, kind: input, shape index: {}]   ;;  %s1644_s3 = inlined_call_operand.vmem [shape: f32[1,128], index: 3, kind: input, shape index: {}]   ;;  %s1645_s4 = inlined_call_operand.vmem [shape: f32[1,32], index: 4, kind: input, shape index: {}]   ;;  %s1646_s5 = inlined_call_operand.vmem [shape: f32[1,32], index: 5, kind: input, shape index: {}]   ;;  %s1647_s6 = inlined_call_operand.hbm [shape: f32[2,32], index: 6, kind: output, shape index: {}]  }
   0x1   :  { %12 = vsyncpa [#allocation6], 0 }
   0x2   :  { %13 = vsyncpa [#allocation4], 0  ;;  %s1423_s21 = smov [#allocation5]   ;;  %s1329_s25 = scalar_lea.hbm %s1642_s1, 512 }
   0x3   :  { %s29_s22 = sshll.u32 %s1423_s21, 4  ;;  %p1330_p0 = scmp.ne.s32.totalorder %s1642_s1, %s1329_s25  ;;  %s30_s22 = int_to_ptr.vmem [resolvable:$true] %s29_s22 }
   0x4   :  { %p1333_p1 = scmp.lt.u32.totalorder %s1329_s25, %s1642_s1 }
   0x6   :  { %p1335_p2 = pnand %p1333_p1, %p1330_p0 }
   0x8   :  { %1338 = shalt.err (!%p1335_p2)
}
   0x9   :  { %s1339_s30 = scalar_lea.vmem %s30_s22, 512  ;;  %p1344_p4 = scmp.lt.s32.totalorder %s30_s22, %s30_s22 }
   0xa   :  { %p1340_p3 = scmp.ne.s32.totalorder %s30_s22, %s1339_s30  ;;  %p1345_p5 = scmp.lt.s32.totalorder %s1339_s30, %s1339_s30 }
   0xc   :  { %p1346_p6 = por %p1345_p5, %p1344_p4 }
   0xe   :  { %p1347_p7 = pnand %p1346_p6, %p1340_p3 }
  0x10   :  { %1350 = shalt.err (!%p1347_p7)
}
  0x11   :  { %s1424_s7 = smov 128   ;;  %s1425_s8 = smov 8  }
  0x12   :  { %35 = dma.hbm_to_vmem [thread:$0]  %s1642_s1, 512, %s30_s22, [#allocation6], %s1424_s7, %s1424_s7, %s1425_s8  }
  0x13   :  { %s1426_s11 = smov [#allocation2]   ;;  %s1427_s13 = smov [#allocation7]  }
  0x14   :  { %s20_s12 = sshll.u32 %s1426_s11, 4  ;;  %s41_s14 = sshll.u32 %s1427_s13, 4  ;;  %s21_s12 = int_to_ptr.vmem [resolvable:$true] %s20_s12  ;;  %s42_s14 = int_to_ptr.vmem [resolvable:$true] %s41_s14 }
  0x15   :  { %s1351_s17 = scalar_lea.hbm %s1641_s0, 128 }
  0x16   :  { %p1352_p8 = scmp.ne.s32.totalorder %s1641_s0, %s1351_s17  ;;  %p1355_p9 = scmp.lt.u32.totalorder %s1351_s17, %s1641_s0 }
  0x18   :  { %p1357_p10 = pnand %p1355_p9, %p1352_p8 }
  0x1a   :  { %1360 = shalt.err (!%p1357_p10)
}
  0x1b   :  { %s1361_s1 = scalar_lea.vmem %s21_s12, 128  ;;  %p1366_p12 = scmp.lt.s32.totalorder %s21_s12, %s21_s12 }
  0x1c   :  { %p1362_p11 = scmp.ne.s32.totalorder %s21_s12, %s1361_s1  ;;  %p1367_p13 = scmp.lt.s32.totalorder %s1361_s1, %s1361_s1 }
  0x1e   :  { %p1368_p0 = por %p1367_p13, %p1366_p12 }
  0x20   :  { %p1369_p1 = pnand %p1368_p0, %p1362_p11 }
  0x22   :  { %1372 = shalt.err (!%p1369_p1)
}
  0x23   :  { %23 = dma.hbm_to_vmem [thread:$0]  %s1641_s0, 128, %s21_s12, [#allocation3]  }
  0x24   :  { %s1373_s26 = scalar_lea.hbm %s1643_s2, 512 }
  0x25   :  { %p1374_p2 = scmp.ne.s32.totalorder %s1643_s2, %s1373_s26  ;;  %p1377_p3 = scmp.lt.u32.totalorder %s1373_s26, %s1643_s2 }
  0x27   :  { %p1379_p4 = pnand %p1377_p3, %p1374_p2 }
  0x29   :  { %1382 = shalt.err (!%p1379_p4)
}
  0x2a   :  { %s1383_s9 = scalar_lea.vmem %s42_s14, 512  ;;  %p1388_p6 = scmp.lt.s32.totalorder %s42_s14, %s42_s14 }
  0x2b   :  { %p1384_p5 = scmp.ne.s32.totalorder %s42_s14, %s1383_s9  ;;  %p1389_p7 = scmp.lt.s32.totalorder %s1383_s9, %s1383_s9 }
  0x2d   :  { %p1390_p8 = por %p1389_p7, %p1388_p6 }
  0x2f   :  { %p1391_p9 = pnand %p1390_p8, %p1384_p5 }
  0x31   :  { %1394 = shalt.err (!%p1391_p9)
}
  0x32   :  { %47 = dma.hbm_to_vmem [thread:$0]  %s1643_s2, 512, %s42_s14, [#allocation6], %s1424_s7, %s1424_s7, %s1425_s8  }
  0x33   :  { %1417 = dma.done.wait [#allocation3], 128  }
  0x34   :  { %1418 = vsyncadd [#allocation3], 4294967168 }
  0x35   :  { %1419 = dma.done.wait [#allocation6], 1024  }
  0x36   :  { %1420 = vsyncadd [#allocation6], 4294966272  ;;  %v1428_v0 = vmov 0.0|0.0   ;;  %vm1429_vm0 = vmmov 0   ;;  %v1430_v1 = vmov 0.0   ;;  %v68_v2 = vld [vmem:[#allocation5] sm:$0xff] }
  0x37   :  { %1215 = vmatprep.subr.bf16.mxu0 %v1428_v0  ;;  %1221 = vmatprep.subr.bf16.mxu1 %v1428_v0  ;;  %v69_v3 = vld [vmem:[#allocation5 + $0x8] sm:$0xff]  ;;  %v63_v4 = vld [vmem:[#allocation7] sm:$0xff]  ;;  %v70_v7 = vld [vmem:[#allocation5 + $0x10] sm:$0xff]  ;;  %vm79_vm1 = vcmask 261120   ;;  %s1431_s11 = smov 32   ;;  %s1432_s13 = smov 64  }
  0x38   :  { %1124 = vmatprep.mubr.msk.f32.mxu0 %vm1429_vm0, %v1430_v1  ;;  %1135 = vmatprep.mubr.msk.f32.mxu1 %vm1429_vm0, %v1430_v1  ;;  %v1216_v5 = vpack.c.bf16 %v69_v3, %v68_v2  ;;  %v64_v6 = vld [vmem:[#allocation7 + $0x8] sm:$0xff]  ;;  %v71_v8 = vld [vmem:[#allocation5 + $0x18] sm:$0xff]  ;;  %v65_v10 = vld [vmem:[#allocation7 + $0x10] sm:$0xff]  ;;  %vm1021_vm2 = vcmask 261127   ;;  %s1434_s14 = smov [#allocation8]  }
  0x39   :  { %v1518_v9 = vpack.c.bf16 %v64_v6, %v63_v4  ;;  %v66_v11 = vld [vmem:[#allocation7 + $0x18] sm:$0xff]  ;;  %v1219_v12 = vpack.c.bf16 %v71_v8, %v70_v7  ;;  %s1034_s15 = sshll.u32 %s1434_s14, 4  ;;  %s1035_s15 = int_to_ptr.vmem [resolvable:$true] %s1034_s15 }
  0x3a   :  { %1217 = vmatpush3.bf16.msra.mxu0 %v1216_v5  ;;  %v1522_v13 = vpack.c.bf16 %v66_v11, %v65_v10  ;;  %v67_v14 = vld [vmem:[#allocation2] sm:$0xff]  ;;  %s1395_s16 = scalar_lea.vmem %s1035_s15, 32  ;;  %p1400_p11 = scmp.lt.s32.totalorder %s1035_s15, %s1035_s15 }
  0x3b   :  { %1223 = vmatpush3.bf16.msra.mxu1 %v1518_v9  ;;  %1218 = vmatprep.subr.bf16.mxu0 %v1428_v0  ;;  %v153_v15 = vld [vmem:[%s1645_s4] sm:$0x1]  ;;  %p1396_p10 = scmp.ne.s32.totalorder %s1035_s15, %s1395_s16  ;;  %p1401_p12 = scmp.lt.s32.totalorder %s1395_s16, %s1395_s16 }
  0x3c   :  { %1224 = vmatprep.subr.bf16.mxu1 %v1428_v0  ;;  %v1044_v16 = vld [vmem:[%s1644_s3] ss:$0 sm:$0xff] }
  0x3d   :  { %v1049_v29 = vld [vmem:[%s1646_s5] ss:$0 sm:$0xff]  ;;  %s1433_s5 = smov 96   ;;  %p1402_p13 = por %p1401_p12, %p1400_p11 }
  0x3e   :  { %1220 = vmatpush3.bf16.msra.mxu0 %v1219_v12 }
  0x3f   :  { %1226 = vmatpush3.bf16.msra.mxu1 %v1522_v13  ;;  %1227 = vmatprep.subr.bf16.mxu0 %v1428_v0  ;;  %p1403_p0 = pnand %p1402_p13, %p1396_p10 }
  0x40   :  { %1233 = vmatprep.subr.bf16.mxu1 %v1428_v0 }
  0x41   :  { %1125 = vmatmul.mubr.msk.f32.vlgmr.msra.gmra.mrb[0].mxu0 %vm79_vm1, %v67_v14 }
  0x42   :  { %1136 = vmatmul.mubr.msk.f32.vlgmr.msra.gmra.mrb[0].mxu1 %vm79_vm1, %v153_v15  ;;  %1229 = vmatpush3.bf16.msra.mxu0 %v1518_v9 }
  0x43   :  { %1230 = vmatprep.subr.bf16.mxu0 %v1428_v0  ;;  %1146 = vmatprep.mubr.msk.f32.mxu0 %vm1429_vm0, %v1430_v1 }
  0x44   :  { %1235 = vmatpush3.bf16.msra.mxu1 %v1518_v9  ;;  %1157 = vmatprep.mubr.msk.f32.mxu1 %vm1429_vm0, %v1430_v1 }
  0x45   :  { %1236 = vmatprep.subr.bf16.mxu1 %v1428_v0 }
  0x46   :  { %1232 = vmatpush3.bf16.msra.mxu0 %v1522_v13 }
  0x47   :  { %1239 = vmatprep.subr.bf16.mxu0 %v1428_v0 }
  0x48   :  { %1238 = vmatpush3.bf16.msra.mxu1 %v1522_v13 }
  0x49   :  { %1245 = vmatprep.subr.bf16.mxu1 %v1428_v0 }
 0x114   :  { %v149_v17 = vpop.f32.mrb[0].mxu0 }
 0x115   :  { %v1548_v18 = vadd.f32 %v1044_v16, %v149_v17  ;;  %v1126_v19 = vpop.f32.mrb[1].mxu0  ;;  %v224_v20 = vpop.f32.mrb[0].mxu1 }
 0x116   :  { %v1137_v21 = vpop.f32.mrb[1].mxu1 }
 0x117   :  { %v228_v22 = vadd.f32 %v224_v20, %v1548_v18 }
 0x119   :  { %v1047_v23 = vmul.f32 -1.442695, %v228_v22 }
 0x11b   :  { %1281 = vpow2.f32 %v1047_v23 }
 0x125   :  { %v1282_v24 = vpop.eup %1281 }
 0x126   :  { %v232_v25 = vadd.f32 1.0, %v1282_v24 }
 0x128   :  { %1283 = vrcp.f32 %v232_v25 }
 0x132   :  { %v1284_v26 = vpop.eup %1283 }
 0x133   :  { %v235_v27 = vmul.f32 2.0, %v1284_v26 }
 0x135   :  { %v1048_v28 = vadd.f32 -1.0, %v235_v27 }
 0x137   :  { %247 = vrot.lane.b32.xlu0 %v1048_v28, %s1431_s11 }
 0x13b   :  { %242 = vrot.lane.b32.xlu0 %v1049_v29, %s1431_s11 }
 0x1a9   :  { %v248_v30 = vpop.permute.xlu0 %247 }
 0x1aa   :  { %v250_v31 = vmul.f32 %v1284_v26, %v248_v30 }
 0x1ac   :  { %252 = vrot.lane.b32.xlu1 %v250_v31, %s1431_s11 }
 0x1ad   :  { %v243_v32 = vpop.permute.xlu0 %242 }
 0x1ae   :  { %v245_v33 = vmul.f32 %v1284_v26, %v243_v32 }
 0x21e   :  { %v253_v34 = vpop.permute.xlu1 %252 }
 0x21f   :  { %v255_v35 = vadd.f32 %v253_v34, %v245_v33 }
 0x221   :  { %1285 = vtanh.f32 %v255_v35  ;;  %v350_v52 = vrot.slane %v255_v35, 7 }
 0x22b   :  { %v1286_v36 = vpop.eup %1285 }
 0x22c   :  { %258 = vrot.lane.b32.xlu1 %v1286_v36, %s1431_s11 }
 0x29e   :  { %v259_v37 = vpop.permute.xlu1 %258 }
 0x29f   :  { %v261_v38 = vmul.f32 %v1284_v26, %v259_v37 }
 0x2a1   :  { %263 = vrot.lane.b32.xlu0 %v261_v38, %s1432_s13 }
 0x313   :  { %v264_v39 = vpop.permute.xlu0 %263 }
 0x314   :  { %1147 = vmatmul.mubr.msk.f32.vlgmr.msra.gmra.mrb[2].mxu0 %vm79_vm1, %v264_v39 }
 0x315   :  { %1241 = vmatpush3.bf16.msra.mxu0 %v1518_v9  ;;  %1168 = vmatprep.mubr.msk.f32.mxu0 %vm1429_vm0, %v1430_v1 }
 0x316   :  { %1242 = vmatprep.subr.bf16.mxu0 %v1428_v0 }
 0x319   :  { %1244 = vmatpush3.bf16.msra.mxu0 %v1522_v13 }
 0x31a   :  { %1251 = vmatprep.subr.bf16.mxu0 %v1428_v0 }
 0x3e7   :  { %v333_v40 = vpop.f32.mrb[2].mxu0 }
 0x3e8   :  { %v338_v41 = vrot.slane %v333_v40, 7  ;;  %v1148_v42 = vpop.f32.mrb[3].mxu0 }
 0x3ea   :  { %v340_v43 = vadd.f32 %v338_v41, %v1548_v18 }
 0x3ec   :  { %v1051_v44 = vmul.f32 -1.442695, %v340_v43 }
 0x3ee   :  { %1287 = vpow2.f32 %v1051_v44 }
 0x3f8   :  { %v1288_v45 = vpop.eup %1287 }
 0x3f9   :  { %v344_v46 = vadd.f32 1.0, %v1288_v45 }
 0x3fb   :  { %1289 = vrcp.f32 %v344_v46 }
 0x405   :  { %v1290_v47 = vpop.eup %1289 }
 0x406   :  { %v347_v48 = vmul.f32 2.0, %v1290_v47  ;;  %v352_v53 = vmul.f32 %v1290_v47, %v350_v52 }
 0x408   :  { %v1052_v49 = vadd.f32 -1.0, %v347_v48 }
 0x40a   :  { %354 = vrot.lane.b32.xlu1 %v1052_v49, %s1431_s11 }
 0x47c   :  { %v355_v50 = vpop.permute.xlu1 %354 }
 0x47d   :  { %v357_v51 = vmul.f32 %v1290_v47, %v355_v50 }
 0x47f   :  { %359 = vrot.lane.b32.xlu0 %v357_v51, %s1431_s11 }
 0x4f1   :  { %v360_v54 = vpop.permute.xlu0 %359 }
 0x4f2   :  { %v362_v55 = vadd.f32 %v360_v54, %v352_v53 }
 0x4f4   :  { %1291 = vtanh.f32 %v362_v55  ;;  %v458_v12 = vrot.slane %v362_v55, 7 }
 0x4fe   :  { %v1292_v56 = vpop.eup %1291 }
 0x4ff   :  { %365 = vrot.lane.b32.xlu1 %v1292_v56, %s1431_s11 }
 0x571   :  { %v366_v57 = vpop.permute.xlu1 %365 }
 0x572   :  { %v368_v58 = vmul.f32 %v1290_v47, %v366_v57 }
 0x574   :  { %v370_v59 = vrot.slane %v368_v58, 1 }
 0x576   :  { %371 = vrot.lane.b32.xlu0 %v370_v59, %s1432_s13 }
 0x5e8   :  { %v372_v60 = vpop.permute.xlu0 %371 }
 0x5e9   :  { %1158 = vmatmul.mubr.msk.f32.vlgmr.msra.gmra.mrb[2].mxu1 %vm79_vm1, %v372_v60 }
 0x5ea   :  { %1247 = vmatpush3.bf16.msra.mxu1 %v1518_v9  ;;  %1179 = vmatprep.mubr.msk.f32.mxu1 %vm1429_vm0, %v1430_v1 }
 0x5eb   :  { %1248 = vmatprep.subr.bf16.mxu1 %v1428_v0 }
 0x5ee   :  { %1250 = vmatpush3.bf16.msra.mxu1 %v1522_v13 }
 0x5ef   :  { %1257 = vmatprep.subr.bf16.mxu1 %v1428_v0 }
 0x6bc   :  { %v441_v61 = vpop.f32.mrb[2].mxu1 }
 0x6bd   :  { %v446_v62 = vrot.slane %v441_v61, 6  ;;  %v1159_v63 = vpop.f32.mrb[3].mxu1 }
 0x6bf   :  { %v448_v2 = vadd.f32 %v446_v62, %v1548_v18 }
 0x6c1   :  { %v1054_v3 = vmul.f32 -1.442695, %v448_v2 }
 0x6c3   :  { %1293 = vpow2.f32 %v1054_v3 }
 0x6cd   :  { %v1294_v4 = vpop.eup %1293 }
 0x6ce   :  { %v452_v5 = vadd.f32 1.0, %v1294_v4 }
 0x6d0   :  { %1295 = vrcp.f32 %v452_v5 }
 0x6da   :  { %v1296_v6 = vpop.eup %1295 }
 0x6db   :  { %v455_v7 = vmul.f32 2.0, %v1296_v6  ;;  %v460_v14 = vmul.f32 %v1296_v6, %v458_v12 }
 0x6dd   :  { %v1055_v8 = vadd.f32 -1.0, %v455_v7 }
 0x6df   :  { %462 = vrot.lane.b32.xlu1 %v1055_v8, %s1431_s11 }
 0x751   :  { %v463_v10 = vpop.permute.xlu1 %462 }
 0x752   :  { %v465_v11 = vmul.f32 %v1296_v6, %v463_v10 }
 0x754   :  { %467 = vrot.lane.b32.xlu0 %v465_v11, %s1431_s11 }
 0x7c6   :  { %v468_v15 = vpop.permute.xlu0 %467 }
 0x7c7   :  { %v470_v16 = vadd.f32 %v468_v15, %v460_v14 }
 0x7c9   :  { %1297 = vtanh.f32 %v470_v16  ;;  %v566_v35 = vrot.slane %v470_v16, 7 }
 0x7d3   :  { %v1298_v17 = vpop.eup %1297 }
 0x7d4   :  { %473 = vrot.lane.b32.xlu1 %v1298_v17, %s1431_s11 }
 0x846   :  { %v474_v19 = vpop.permute.xlu1 %473 }
 0x847   :  { %v476_v20 = vmul.f32 %v1296_v6, %v474_v19 }
 0x849   :  { %v478_v21 = vrot.slane %v476_v20, 2 }
 0x84b   :  { %479 = vrot.lane.b32.xlu0 %v478_v21, %s1432_s13 }
 0x8bd   :  { %v480_v22 = vpop.permute.xlu0 %479 }
 0x8be   :  { %1169 = vmatmul.mubr.msk.f32.vlgmr.msra.gmra.mrb[4].mxu0 %vm79_vm1, %v480_v22 }
 0x8bf   :  { %1253 = vmatpush3.bf16.msra.mxu0 %v1518_v9  ;;  %1190 = vmatprep.mubr.msk.f32.mxu0 %vm1429_vm0, %v1430_v1 }
 0x8c0   :  { %1254 = vmatprep.subr.bf16.mxu0 %v1428_v0 }
 0x8c3   :  { %1256 = vmatpush3.bf16.msra.mxu0 %v1522_v13 }
 0x8c4   :  { %1263 = vmatprep.subr.bf16.mxu0 %v1428_v0 }
 0x991   :  { %v549_v23 = vpop.f32.mrb[4].mxu0 }
 0x992   :  { %v554_v24 = vrot.slane %v549_v23, 5  ;;  %v1170_v25 = vpop.f32.mrb[5].mxu0 }
 0x994   :  { %v556_v26 = vadd.f32 %v554_v24, %v1548_v18 }
 0x996   :  { %v1057_v27 = vmul.f32 -1.442695, %v556_v26 }
 0x998   :  { %1299 = vpow2.f32 %v1057_v27 }
 0x9a2   :  { %v1300_v28 = vpop.eup %1299 }
 0x9a3   :  { %v560_v29 = vadd.f32 1.0, %v1300_v28 }
 0x9a5   :  { %1301 = vrcp.f32 %v560_v29 }
 0x9af   :  { %v1302_v30 = vpop.eup %1301 }
 0x9b0   :  { %v563_v31 = vmul.f32 2.0, %v1302_v30  ;;  %v568_v36 = vmul.f32 %v1302_v30, %v566_v35 }
 0x9b2   :  { %v1058_v32 = vadd.f32 -1.0, %v563_v31 }
 0x9b4   :  { %570 = vrot.lane.b32.xlu1 %v1058_v32, %s1431_s11 }
 0xa26   :  { %v571_v33 = vpop.permute.xlu1 %570 }
 0xa27   :  { %v573_v34 = vmul.f32 %v1302_v30, %v571_v33 }
 0xa29   :  { %575 = vrot.lane.b32.xlu0 %v573_v34, %s1431_s11 }
 0xa9b   :  { %v576_v37 = vpop.permute.xlu0 %575 }
 0xa9c   :  { %v578_v38 = vadd.f32 %v576_v37, %v568_v36 }
 0xa9e   :  { %1303 = vtanh.f32 %v578_v38  ;;  %v674_v56 = vrot.slane %v578_v38, 7 }
 0xaa8   :  { %v1304_v39 = vpop.eup %1303 }
 0xaa9   :  { %581 = vrot.lane.b32.xlu1 %v1304_v39, %s1431_s11 }
 0xb1b   :  { %v582_v40 = vpop.permute.xlu1 %581 }
 0xb1c   :  { %v584_v41 = vmul.f32 %v1302_v30, %v582_v40 }
 0xb1e   :  { %v586_v42 = vrot.slane %v584_v41, 3 }
 0xb20   :  { %587 = vrot.lane.b32.xlu0 %v586_v42, %s1432_s13 }
 0xb92   :  { %v588_v43 = vpop.permute.xlu0 %587 }
 0xb93   :  { %1180 = vmatmul.mubr.msk.f32.vlgmr.msra.gmra.mrb[4].mxu1 %vm79_vm1, %v588_v43 }
 0xb94   :  { %1259 = vmatpush3.bf16.msra.mxu1 %v1518_v9  ;;  %1201 = vmatprep.mubr.msk.f32.mxu1 %vm1429_vm0, %v1430_v1 }
 0xb95   :  { %1260 = vmatprep.subr.bf16.mxu1 %v1428_v0 }
 0xb98   :  { %1262 = vmatpush3.bf16.msra.mxu1 %v1522_v13 }
 0xc66   :  { %v657_v44 = vpop.f32.mrb[4].mxu1 }
 0xc67   :  { %v662_v45 = vrot.slane %v657_v44, 4  ;;  %v1181_v46 = vpop.f32.mrb[5].mxu1 }
 0xc69   :  { %v664_v47 = vadd.f32 %v662_v45, %v1548_v18 }
 0xc6b   :  { %v1060_v48 = vmul.f32 -1.442695, %v664_v47 }
 0xc6d   :  { %1305 = vpow2.f32 %v1060_v48 }
 0xc77   :  { %v1306_v49 = vpop.eup %1305 }
 0xc78   :  { %v668_v50 = vadd.f32 1.0, %v1306_v49 }
 0xc7a   :  { %1307 = vrcp.f32 %v668_v50 }
 0xc84   :  { %v1308_v51 = vpop.eup %1307 }
 0xc85   :  { %v671_v52 = vmul.f32 2.0, %v1308_v51  ;;  %v676_v57 = vmul.f32 %v1308_v51, %v674_v56 }
 0xc87   :  { %v1061_v53 = vadd.f32 -1.0, %v671_v52 }
 0xc89   :  { %678 = vrot.lane.b32.xlu1 %v1061_v53, %s1431_s11 }
 0xcfb   :  { %v679_v54 = vpop.permute.xlu1 %678 }
 0xcfc   :  { %v681_v55 = vmul.f32 %v1308_v51, %v679_v54 }
 0xcfe   :  { %683 = vrot.lane.b32.xlu0 %v681_v55, %s1431_s11 }
 0xd70   :  { %v684_v58 = vpop.permute.xlu0 %683 }
 0xd71   :  { %v686_v59 = vadd.f32 %v684_v58, %v676_v57 }
 0xd73   :  { %1309 = vtanh.f32 %v686_v59 }
 0xd7d   :  { %v1310_v60 = vpop.eup %1309 }
 0xd7e   :  { %689 = vrot.lane.b32.xlu1 %v1310_v60, %s1431_s11 }
 0xdf0   :  { %v690_v61 = vpop.permute.xlu1 %689 }
 0xdf1   :  { %v692_v62 = vmul.f32 %v1308_v51, %v690_v61 }
 0xdf3   :  { %v694_v63 = vrot.slane %v692_v62, 4 }
 0xdf5   :  { %695 = vrot.lane.b32.xlu0 %v694_v63, %s1432_s13 }
 0xe67   :  { %v696_v2 = vpop.permute.xlu0 %695 }
 0xe68   :  { %1191 = vmatmul.mubr.msk.f32.vlgmr.msra.gmra.mrb[6].mxu0 %vm79_vm1, %v696_v2 }
 0xe69   :  { %1265 = vmatpush3.bf16.msra.mxu0 %v1518_v9  ;;  %1212 = vmatprep.mubr.msk.f32.mxu0 %vm1429_vm0, %v1430_v1 }
 0xe6a   :  { %1266 = vmatprep.subr.bf16.mxu0 %v1428_v0  ;;  %v782_v0 = vrot.slane %v686_v59, 7 }
 0xe6d   :  { %1268 = vmatpush3.bf16.msra.mxu0 %v1522_v13 }
 0xf3b   :  { %v765_v3 = vpop.f32.mrb[6].mxu0 }
 0xf3c   :  { %v770_v4 = vrot.slane %v765_v3, 3  ;;  %v1192_v5 = vpop.f32.mrb[7].mxu0 }
 0xf3e   :  { %v772_v6 = vadd.f32 %v770_v4, %v1548_v18 }
 0xf40   :  { %v1063_v7 = vmul.f32 -1.442695, %v772_v6 }
 0xf42   :  { %1311 = vpow2.f32 %v1063_v7 }
 0xf4c   :  { %v1312_v8 = vpop.eup %1311 }
 0xf4d   :  { %v776_v10 = vadd.f32 1.0, %v1312_v8 }
 0xf4f   :  { %1313 = vrcp.f32 %v776_v10 }
 0xf59   :  { %v1314_v11 = vpop.eup %1313 }
 0xf5a   :  { %v779_v12 = vmul.f32 2.0, %v1314_v11  ;;  %v784_v13 = vmul.f32 %v1314_v11, %v782_v0 }
 0xf5c   :  { %v1064_v9 = vadd.f32 -1.0, %v779_v12 }
 0xf5e   :  { %786 = vrot.lane.b32.xlu1 %v1064_v9, %s1431_s11 }
 0xfd0   :  { %v787_v1 = vpop.permute.xlu1 %786 }
 0xfd1   :  { %v789_v14 = vmul.f32 %v1314_v11, %v787_v1 }
 0xfd3   :  { %791 = vrot.lane.b32.xlu0 %v789_v14, %s1431_s11 }
0x1045   :  { %v792_v15 = vpop.permute.xlu0 %791 }
0x1046   :  { %v794_v16 = vadd.f32 %v792_v15, %v784_v13 }
0x1048   :  { %1315 = vtanh.f32 %v794_v16  ;;  %v890_v35 = vrot.slane %v794_v16, 7 }
0x1052   :  { %v1316_v17 = vpop.eup %1315 }
0x1053   :  { %797 = vrot.lane.b32.xlu1 %v1316_v17, %s1431_s11 }
0x10c5   :  { %v798_v19 = vpop.permute.xlu1 %797 }
0x10c6   :  { %v800_v20 = vmul.f32 %v1314_v11, %v798_v19 }
0x10c8   :  { %v802_v21 = vrot.slane %v800_v20, 5 }
0x10ca   :  { %803 = vrot.lane.b32.xlu0 %v802_v21, %s1432_s13 }
0x113c   :  { %v804_v22 = vpop.permute.xlu0 %803 }
0x113d   :  { %1202 = vmatmul.mubr.msk.f32.vlgmr.msra.gmra.mrb[6].mxu1 %vm79_vm1, %v804_v22 }
0x1210   :  { %v873_v23 = vpop.f32.mrb[6].mxu1 }
0x1211   :  { %v878_v24 = vrot.slane %v873_v23, 2  ;;  %v1203_v25 = vpop.f32.mrb[7].mxu1 }
0x1213   :  { %v880_v26 = vadd.f32 %v878_v24, %v1548_v18 }
0x1215   :  { %v1066_v27 = vmul.f32 -1.442695, %v880_v26 }
0x1217   :  { %1317 = vpow2.f32 %v1066_v27 }
0x1221   :  { %v1318_v28 = vpop.eup %1317 }
0x1222   :  { %v884_v29 = vadd.f32 1.0, %v1318_v28 }
0x1224   :  { %1319 = vrcp.f32 %v884_v29 }
0x122e   :  { %v1320_v30 = vpop.eup %1319 }
0x122f   :  { %v887_v31 = vmul.f32 2.0, %v1320_v30  ;;  %v892_v36 = vmul.f32 %v1320_v30, %v890_v35 }
0x1231   :  { %v1067_v32 = vadd.f32 -1.0, %v887_v31 }
0x1233   :  { %894 = vrot.lane.b32.xlu1 %v1067_v32, %s1431_s11 }
0x12a5   :  { %v895_v33 = vpop.permute.xlu1 %894 }
0x12a6   :  { %v897_v34 = vmul.f32 %v1320_v30, %v895_v33 }
0x12a8   :  { %899 = vrot.lane.b32.xlu0 %v897_v34, %s1431_s11 }
0x131a   :  { %v900_v37 = vpop.permute.xlu0 %899 }
0x131b   :  { %v902_v38 = vadd.f32 %v900_v37, %v892_v36 }
0x131d   :  { %1321 = vtanh.f32 %v902_v38  ;;  %v998_v56 = vrot.slane %v902_v38, 7 }
0x1327   :  { %v1322_v39 = vpop.eup %1321 }
0x1328   :  { %905 = vrot.lane.b32.xlu1 %v1322_v39, %s1431_s11 }
0x139a   :  { %v906_v40 = vpop.permute.xlu1 %905 }
0x139b   :  { %v908_v41 = vmul.f32 %v1320_v30, %v906_v40 }
0x139d   :  { %v910_v42 = vrot.slane %v908_v41, 6 }
0x139f   :  { %911 = vrot.lane.b32.xlu0 %v910_v42, %s1432_s13 }
0x1411   :  { %v912_v43 = vpop.permute.xlu0 %911 }
0x1412   :  { %1213 = vmatmul.mubr.msk.f32.vlgmr.msra.gmra.mrb[8].mxu0 %vm79_vm1, %v912_v43 }
0x14e5   :  { %v981_v44 = vpop.f32.mrb[8].mxu0 }
0x14e6   :  { %v986_v45 = vrot.slane %v981_v44, 1  ;;  %v1214_v46 = vpop.f32.mrb[9].mxu0 }
0x14e8   :  { %v988_v47 = vadd.f32 %v986_v45, %v1548_v18 }
0x14ea   :  { %v1069_v48 = vmul.f32 -1.442695, %v988_v47 }
0x14ec   :  { %1323 = vpow2.f32 %v1069_v48 }
0x14f6   :  { %v1324_v49 = vpop.eup %1323 }
0x14f7   :  { %v992_v50 = vadd.f32 1.0, %v1324_v49 }
0x14f9   :  { %1325 = vrcp.f32 %v992_v50 }
0x1503   :  { %v1326_v51 = vpop.eup %1325 }
0x1504   :  { %v995_v52 = vmul.f32 2.0, %v1326_v51  ;;  %v1000_v57 = vmul.f32 %v1326_v51, %v998_v56 }
0x1506   :  { %v1070_v53 = vadd.f32 -1.0, %v995_v52 }
0x1508   :  { %1002 = vrot.lane.b32.xlu1 %v1070_v53, %s1431_s11 }
0x157a   :  { %v1003_v54 = vpop.permute.xlu1 %1002 }
0x157b   :  { %v1005_v55 = vmul.f32 %v1326_v51, %v1003_v54 }
0x157d   :  { %1007 = vrot.lane.b32.xlu0 %v1005_v55, %s1431_s11 }
0x15ef   :  { %v1008_v58 = vpop.permute.xlu0 %1007 }
0x15f0   :  { %v1010_v59 = vadd.f32 %v1008_v58, %v1000_v57 }
0x15f2   :  { %1327 = vtanh.f32 %v1010_v59 }
0x15fc   :  { %v1328_v18 = vpop.eup %1327 }
0x15fd   :  { %1013 = vrot.lane.b32.xlu1 %v1328_v18, %s1431_s11 }
0x1601   :  { %1024 = vrot.lane.b32.xlu1 %v1010_v59, %s1433_s5 }
0x166f   :  { %v1014_v60 = vpop.permute.xlu1 %1013 }
0x1670   :  { %v1016_v61 = vmul.f32 %v1326_v51, %v1014_v60 }
0x1672   :  { %1018 = vrot.lane.b32.xlu0 %v1016_v61, %s1432_s13 }
0x1673   :  { %v1025_v62 = vpop.permute.xlu1 %1024 }
0x1674   :  { %1027 = vst.msk [vmem:[#allocation8 - $0x6] sm:$0x80] %vm1021_vm2, %v1025_v62 }
0x16e4   :  { %v1019_v63 = vpop.permute.xlu0 %1018 }
0x16e5   :  { %1022 = vst.msk [vmem:[#allocation8 - $0x7] sm:$0x80] %vm1021_vm2, %v1019_v63 }
0x16e6   :  { %1406 = shalt.err (!%p1403_p0)
}
0x16e7   :  { %s1407_s19 = scalar_lea.hbm %s1647_s6, 32 }
0x16e8   :  { %p1408_p1 = scmp.ne.s32.totalorder %s1647_s6, %s1407_s19  ;;  %p1411_p2 = scmp.lt.u32.totalorder %s1407_s19, %s1647_s6 }
0x16ea   :  { %p1413_p3 = pnand %p1411_p2, %p1408_p1 }
0x16ec   :  { %1416 = shalt.err (!%p1413_p3)
}
0x16ed   :  { %1037 = dma.vmem_to_hbm [thread:$0]  %s1035_s15, 32, %s1647_s6, [#allocation4]  }
0x16ee   :  { %1421 = dma.done.wait [#allocation4], 32  }
0x16ef   :  { %1422 = vsyncadd [#allocation4], 4294967264 }
0x16f0   :  { %1041 = vsyncpa [#allocation3], 1 }
0x16f1   :  { %1042 = vsyncpa [#allocation6], 1 }
0x16f2   :  { %1043 = vsyncpa [#allocation4], 1 }

</bundles_post_ra>
